<compile_context>
chip_gen: v5e
topology: v5e:2x2
jax: 0.10.0
libtpu: 0.0.40
codegen_flags: <defaults>
</compile_context>

<pallas_src>
import jax
import jax.numpy as jnp
from jax.experimental import pallas as pl
from jax.experimental.pallas import tpu as pltpu


def _add_conv1x1_kernel(a_ref, b_ref, w_ref, o_ref):
    # a_ref, b_ref: (C_in, HWp)   w_ref: (TCO, C_in)   o_ref: (TCO, HWp)
    s = a_ref[...] + b_ref[...]                          # fused elementwise add (VPU)
    # TODO(synk): cast s / w to bf16 (keep f32 accumulate) if shapes ever grow
    # enough to become MXU-bound on v5e; at this size the op is HBM/launch-bound.
    o_ref[...] = jnp.dot(
        w_ref[...], s, preferred_element_type=jnp.float32
    ).astype(o_ref.dtype)                                # 1x1 conv == W @ X (MXU)


def _pick_cout_block(c_out):
    # Prefer 4 grid steps along C_out (pipelining + dual-TC on v7x), else 2, else 1.
    for nblk in (4, 2):
        blk = c_out // nblk
        if c_out % nblk == 0 and blk % 8 == 0:
            return blk
    return c_out


def add_conv1x1(x204, x190, weight):
    """x204, x190: (N, C_in, H, W) float32.  weight: (C_out, C_in, 1, 1) float32."""
    N, C_in, H, W = x204.shape
    C_out = weight.shape[0]
    HW = H * W
    HWp = pl.cdiv(HW, 128) * 128          # lane-dense last dim: 196 -> 256
    TCO = _pick_cout_block(C_out)         # 672 -> 168 (4 C_out blocks)

    # Free views for contiguous NCHW / OIHW tensors; pad the lane dim once.
    a = x204.reshape(N, C_in, HW)
    b = x190.reshape(N, C_in, HW)
    if HWp != HW:
        pad = ((0, 0), (0, 0), (0, HWp - HW))
        a = jnp.pad(a, pad)
        b = jnp.pad(b, pad)
    w = weight.reshape(C_out, C_in)

    # Advisory cost hint so XLA schedules this tiny custom call sensibly.
    flops = N * (2 * C_out * C_in * HWp + C_in * HWp)
    bytes_accessed = 4 * (2 * N * C_in * HWp + C_out * C_in + N * C_out * HWp)

    out = pl.pallas_call(
        _add_conv1x1_kernel,
        out_shape=jax.ShapeDtypeStruct((N, C_out, HWp), x204.dtype),
        grid=(N, C_out // TCO),
        in_specs=[
            # Activations: index_map constant along the C_out axis -> blocks stay
            # VMEM-resident (no re-fetch) while C_out tiles stream through.
            pl.BlockSpec((None, C_in, HWp), lambda n, co: (n, 0, 0)),
            pl.BlockSpec((None, C_in, HWp), lambda n, co: (n, 0, 0)),
            # Weight: one (TCO, C_in) tile per C_out step, double-buffered by Pallas.
            pl.BlockSpec((TCO, C_in), lambda n, co: (co, 0)),
        ],
        out_specs=pl.BlockSpec((None, TCO, HWp), lambda n, co: (n, co, 0)),
        compiler_params=pltpu.CompilerParams(
            # Both axes independent -> shardable across v7x's two TensorCores.
            dimension_semantics=("parallel", "parallel"),
        ),
        cost_estimate=pl.CostEstimate(
            flops=flops, transcendentals=0, bytes_accessed=bytes_accessed
        ),
    )(a, b, w)

    # TODO(synk): if H*W grows (e.g. 56x56), tile HWp with 512-1024 lane blocks
    # sized for v7x's 64 MiB VMEM (2*(a+b+out tiles) + weight <= ~16-24 MiB).
    # TODO(synk): at this size the op is launch-overhead bound -- fuse the
    # downstream consumer (or emit bf16 output) into this pallas_call when possible.

    # Drop the padded lanes; free reshape back to NCHW.
    return out[:, :, :HW].reshape(N, C_out, H, W)


def reference(x204, x190, weight):
    s = x204 + x190
    return jnp.einsum(
        "nchw,oc->nohw", s, weight.reshape(weight.shape[0], weight.shape[1])
    )


if __name__ == "__main__":
    key = jax.random.PRNGKey(0)
    k1, k2, k3 = jax.random.split(key, 3)

    N, C_in, H, W = 1, 112, 14, 14
    C_out = 672

    x204 = jax.random.normal(k1, (N, C_in, H, W), dtype=jnp.float32)
    x190 = jax.random.normal(k2, (N, C_in, H, W), dtype=jnp.float32)
    # Conv2d weight (kaiming-uniform-like bound), shape (C_out, C_in, 1, 1)
    bound = 1.0 / (C_in ** 0.5)
    weight = jax.random.uniform(
        k3, (C_out, C_in, 1, 1), dtype=jnp.float32, minval=-bound, maxval=bound
    )

    out = add_conv1x1(x204, x190, weight)
    jax.block_until_ready(out)

    ref = reference(x204, x190, weight)
    assert out.shape == (N, C_out, H, W), out.shape
    assert jnp.allclose(out, ref, atol=1e-4, rtol=1e-4), "mismatch vs reference"

    print("KERNEL_OK")
</pallas_src>

<mosaic_0001>
module attributes {stable_mosaic.version = 11 : i64} {
  func.func @_add_conv1x1_kernel(%arg0: i32, %arg1: i32, %arg2: memref<1x112x256xf32, #tpu.memory_space<vmem>>, %arg3: memref<1x112x256xf32, #tpu.memory_space<vmem>>, %arg4: memref<168x112xf32, #tpu.memory_space<vmem>>, %arg5: memref<1x168x256xf32, #tpu.memory_space<vmem>>) attributes {dimension_semantics = [#tpu.dimension_semantics<parallel>, #tpu.dimension_semantics<parallel>], iteration_bounds = array<i64: 1, 4>, scalar_prefetch = 0 : i64, scratch_operands = 0 : i64, tpu.core_type = #tpu.core_type<tc>, window_params = [{transform_indices = @transform_0, window_bounds = array<i64: 1, 112, 256>}, {transform_indices = @transform_1, window_bounds = array<i64: 1, 112, 256>}, {transform_indices = @transform_2, window_bounds = array<i64: 168, 112>}, {transform_indices = @transform_3, window_bounds = array<i64: 1, 168, 256>}]} {
    %c0 = arith.constant 0 : index
    %c0_0 = arith.constant 0 : index
    %c0_1 = arith.constant 0 : index
    %0 = vector.load %arg2[%c0, %c0_0, %c0_1] : memref<1x112x256xf32, #tpu.memory_space<vmem>>, vector<1x112x256xf32>
    %1 = vector.shape_cast %0 : vector<1x112x256xf32> to vector<112x256xf32>
    %c0_2 = arith.constant 0 : index
    %c0_3 = arith.constant 0 : index
    %c0_4 = arith.constant 0 : index
    %2 = vector.load %arg3[%c0_2, %c0_3, %c0_4] : memref<1x112x256xf32, #tpu.memory_space<vmem>>, vector<1x112x256xf32>
    %3 = vector.shape_cast %2 : vector<1x112x256xf32> to vector<112x256xf32>
    %4 = arith.addf %1, %3 : vector<112x256xf32>
    %c0_5 = arith.constant 0 : index
    %c0_6 = arith.constant 0 : index
    %5 = vector.load %arg4[%c0_5, %c0_6] : memref<168x112xf32, #tpu.memory_space<vmem>>, vector<168x112xf32>
    %cst = arith.constant dense<0.000000e+00> : vector<168x256xf32>
    %6 = tpu.matmul %5, %4, %cst {dimension_numbers = #tpu.dot_dimension_numbers<[1], [0], [0], [1], [0, 0, 1, 1], [], []>} : vector<168x112xf32>, vector<112x256xf32>, vector<168x256xf32> -> vector<168x256xf32>
    %c0_7 = arith.constant 0 : index
    %c0_8 = arith.constant 0 : index
    %c0_9 = arith.constant 0 : index
    %7 = vector.load %arg5[%c0_7, %c0_8, %c0_9] : memref<1x168x256xf32, #tpu.memory_space<vmem>>, vector<1x168x256xf32>
    %8 = vector.shape_cast %7 : vector<1x168x256xf32> to vector<168x256xf32>
    %9 = vector.shape_cast %6 : vector<168x256xf32> to vector<1x168x256xf32>
    tpu.vector_store %arg5[%c0_7, %c0_8, %c0_9], %9 {strides = array<i32>} : memref<1x168x256xf32, #tpu.memory_space<vmem>>, vector<1x168x256xf32>,
    return
  }
  func.func @transform_0(%arg0: i32, %arg1: i32) -> (i32, i32, i32) {
    %c0_i32 = arith.constant 0 : i32
    %c0_i32_0 = arith.constant 0 : i32
    %c0_i32_1 = arith.constant 0 : i32
    return %arg0, %c0_i32, %c0_i32_0 : i32, i32, i32
  }
  func.func @transform_1(%arg0: i32, %arg1: i32) -> (i32, i32, i32) {
    %c0_i32 = arith.constant 0 : i32
    %c0_i32_0 = arith.constant 0 : i32
    %c0_i32_1 = arith.constant 0 : i32
    return %arg0, %c0_i32, %c0_i32_0 : i32, i32, i32
  }
  func.func @transform_2(%arg0: i32, %arg1: i32) -> (i32, i32) {
    %c0_i32 = arith.constant 0 : i32
    %c0_i32_0 = arith.constant 0 : i32
    return %arg1, %c0_i32 : i32, i32
  }
  func.func @transform_3(%arg0: i32, %arg1: i32) -> (i32, i32, i32) {
    %c0_i32 = arith.constant 0 : i32
    %c0_i32_0 = arith.constant 0 : i32
    return %arg0, %arg1, %c0_i32 : i32, i32, i32
  }
}

</mosaic_0001>

<bundles_post_ra>
// kernel: tpu_custom_call.1
= control target key start
LH: loop header
LB: loop body
LE: loop exit
PB: predicated region body
PF: predicated region fallthrough
CT: control target
= control target key end

     0   :  { %s1403_s0 = inlined_call_operand.hbm [shape: f32[1,112,256], index: 0, kind: input, shape index: {}]   ;;  %s1404_s1 = inlined_call_operand.hbm [shape: f32[1,112,256], index: 1, kind: input, shape index: {}]   ;;  %s1405_s2 = inlined_call_operand.hbm [shape: f32[672,112], index: 2, kind: input, shape index: {}]   ;;  %s1406_s3 = inlined_call_operand.hbm [shape: f32[1,672,256], index: 3, kind: output, shape index: {}]  }
   0x1   :  { %1407 = sst [smem:[#allocation13_spill]] %s1403_s0 }
   0x2   :  { %8 = vsyncpa [#allocation3], 0 }
   0x3   :  { %9 = vsyncpa [#allocation6], 0 }
   0x4   :  { %10 = vsyncpa [#allocation4], 0 }
   0x5   :  { %12 = vsyncpa [#allocation4 + $0x1], 0  ;;  %s1141_s12 = smov 0   ;;  %s1143_s13 = smov 0  }
   0x6   :  { %s1145_s14 = smov 0   ;;  %s1147_s15 = smov 0  }
   0x7   :  { %s1149_s16 = smov 0   ;;  %s1151_s17 = smov 0  }
   0x8 LB: > { %s1172_s18 = sadd.s32 4294967295, %s1111_s17   ;;  %s752_s19 = sadd.s32 4294967294, %s1111_s17   ;;  %s1111_s17 = sphi %s1151_s17, %s18_s17   ;;  %s1107_s16 = sphi %s1149_s16, %s1417_s16   ;;  %s1103_s15 = sphi %s1147_s15, %s1416_s15   ;;  %s1099_s14 = sphi %s1145_s14, %s1415_s14   ;;  %s1095_s13 = sphi %s1143_s13, %s1414_s13   ;;  %s1091_s12 = sphi %s1141_s12, %s1413_s12  }
   0x9   : > { %p102_p0 = scmp.ne.s32.totalorder %s1095_s13, %s1091_s12  ;;  %p103_p1 = scmp.eq.s32.totalorder %s1172_s18, 0 }
   0xa   : > { %p128_p2 = scmp.eq.s32.totalorder %s1172_s18, 3  ;;  %p134_p3 = scmp.eq.s32.totalorder %s752_s19, 3 }
   0xb   : > { %p1181_p4 = por %p103_p1, %p102_p0  ;;  %p753_p5 = scmp.ge.s32.totalorder %s1111_s17, 1 }
   0xc   : > { %p1186_p6 = por %p134_p3, %p102_p0  ;;  %p141_p7 = scmp.lt.s32.totalorder %s1111_s17, 5 }
   0xd   : > { %s1410_s0 = sld [smem:[#allocation13_spill]]  ;;  %s1113_s26 = smov [#allocation2]  }
   0xe   : > { %p1194_p8 = pnand %p753_p5, %p141_p7  ;;  %s157_s27 = sshll.u32 %s1113_s26, 4  ;;  %s158_s27 = int_to_ptr.vmem [resolvable:$true] %s157_s27 }
   0xf   : > { %s172_s30 = sshll.u32 %s1404_s1, 4  ;;  %s1114_s4 = smov 256   ;;  %s173_s30 = int_to_ptr.hbm [resolvable:$true] %s172_s30 }
  0x10   : > { %p854_p9 = pneg %p1194_p8  ;;  %s1115_s5 = smov 16  }
  0x11   : > { %s1116_s6 = smov [#allocation5]   ;;  %s27_s8 = sadd.s32 1, %s1107_s16 }
  0x12   : > { %p855_p10 = pnand %p854_p9, %p103_p1  ;;  %s174_s7 = sshll.u32 %s1116_s6, 4  ;;  %s175_s7 = int_to_ptr.vmem [resolvable:$true] %s174_s7 }
  0x13   : > { %s155_s24 = sshll.u32 %s1410_s0, 4  ;;  %s89_s9 = sadd.s32 1, %s1099_s14  ;;  %s156_s24 = int_to_ptr.hbm [resolvable:$true] %s155_s24 }
  0x14   : > { %857 = dma.hbm_to_vmem [thread:$0]  (!%p855_p10), %s156_s24, 3584, %s158_s27, [#allocation3], %s1114_s4, %s1114_s4, %s1115_s5  }
  0x15   : > { %860 = dma.hbm_to_vmem [thread:$0]  (!%p855_p10), %s173_s30, 3584, %s175_s7, [#allocation6], %s1114_s4, %s1114_s4, %s1115_s5  }
  0x16   : > { %p28_p11 = scmp.ge.s32.totalorder %s27_s8, 4  ;;  %p96_p12 = scmp.ne.s32.totalorder %s1099_s14, %s1095_s13 }
  0x17   : > { %p97_p13 = scmp.eq.s32.totalorder %s1111_s17, 0  ;;  %p871_p0 = scmp.lt.s32.totalorder %s1111_s17, 4 }
  0x18   : > { %s1419_s8 = smov (%p28_p11, %s27_s8), 0  ;;  %p1215_p5 = por %p128_p2, %p96_p12 }
  0x19   : > { %p98_p3 = por %p97_p13, %p96_p12  ;;  %s86_s11 = ssub.s32 %s1107_s16, %s1419_s8 }
  0x1a   : > { %s188_s19 = sand.u32 1, %s1111_s17   ;;  %p87_p7 = scmp.eq.s32.totalorder %s86_s11, 0 }
  0x1b   : > { %s190_s22 = sand.u32 1, %s1099_s14   ;;  %s807_s23 = smul.u32 168, %s1107_s16 }
  0x1c   : > { %s1225_s24 = scalar_select %p87_p7, %s1099_s14, %s89_s9  }
  0x1d   : > { %s839_s26 = smul.u32 168, %s190_s22  ;;  %s197_s29 = scalar_lea.hbm %s1405_s2, %s807_s23 }
  0x1e   : > { %s198_s30 = sshll.u32 %s197_s29, 4  ;;  %p862_p9 = pnand %p871_p0, %p98_p3  ;;  %s199_s30 = int_to_ptr.hbm [resolvable:$true] %s198_s30 }
  0x1f   : > { %s192_s4 = scalar_lea.vmem [#allocation7], %s839_s26  ;;  %s189_s6 = scalar_lea.sflag [#allocation3], %s188_s19 }
  0x20   : > { %s200_s5 = sshll.u32 %s192_s4, 4  ;;  %s1117_s7 = smov 128   ;;  %s201_s5 = int_to_ptr.vmem [resolvable:$true] %s200_s5 }
  0x21   : > { %s1118_s0 = smov 8   ;;  %212 = sbr.rel (%p1194_p8) target bundleno = 293 (0x125), region = 32 }
  0x22   : > { %864 = dma.hbm_to_vmem [thread:$0]  (!%p862_p9), %s199_s30, 2688, %s201_s5, %s189_s6, %s1117_s7, %s1117_s7, %s1118_s0  }
  0x26   : > { %1074 = dma.done.wait (%p103_p1), [#allocation3], 3584  }
  0x27   : > { %1076 = vsyncadd (%p103_p1), [#allocation3], 4294963712 }
  0x28   : > { %1078 = dma.done.wait (%p103_p1), [#allocation6], 3584  }
  0x29   : > { %1080 = vsyncadd (%p103_p1), [#allocation6], 4294963712  ;;  %s224_s9 = sand.u32 1, %s1172_s18   ;;  %s1244_s0 = sand.u32 1, %s1095_s13  }
  0x2a   : > { %s840_s25 = smul.u32 168, %s1244_s0  ;;  %s225_s11 = scalar_lea.sflag [#allocation3], %s224_s9 }
  0x2c   : > { %s1247_s19 = scalar_lea.vmem [#allocation7], %s840_s25 }
  0x2d   : > { %1082 = dma.done.wait (%p1181_p4), %s225_s11, 2688  }
  0x2e   : > { %1084 = vsyncadd (%p1181_p4), %s225_s11, 4294964608  ;;  %v280_v0 = vld [vmem:[#allocation2 + $0xd0] sm:$0xff]  ;;  %v278_v2 = vld [vmem:[#allocation2 + $0xc0] sm:$0xff]  ;;  %vm359_vm0 = vcmask 916480   ;;  %s841_s18 = smul.u32 336, %s1244_s0  ;;  %s1041_s7 = scalar_lea.hbm %s1406_s3, 1344 }
  0x2f   : > { %v308_v1 = vld [vmem:[#allocation5 + $0xd0] sm:$0xff]  ;;  %v306_v4 = vld [vmem:[#allocation5 + $0xc0] sm:$0xff]  ;;  %v281_v10 = vld [vmem:[#allocation2 + $0xd8] sm:$0xff]  ;;  %s810_s22 = smul.u32 336, %s1103_s15  ;;  %s626_s15 = scalar_lea.sflag [#allocation4], %s1244_s0 }
  0x30   : > { %v336_v3 = vadd.f32 %v308_v1, %v280_v0  ;;  %v276_v5 = vld [vmem:[#allocation2 + $0xb0] sm:$0xff]  ;;  %v334_v7 = vadd.f32 %v306_v4, %v278_v2  ;;  %v274_v8 = vld [vmem:[#allocation2 + $0xa0] sm:$0xff]  ;;  %v309_v12 = vld [vmem:[#allocation5 + $0xd8] sm:$0xff]  ;;  %s1321_s20 = scalar_lea.vmem [#allocation8], %s841_s18 }
  0x31   : > { %v304_v6 = vld [vmem:[#allocation5 + $0xb0] sm:$0xff]  ;;  %v302_v9 = vld [vmem:[#allocation5 + $0xa0] sm:$0xff]  ;;  %v337_v14 = vadd.f32 %v309_v12, %v281_v10  ;;  %v279_v16 = vld [vmem:[#allocation2 + $0xc8] sm:$0xff]  ;;  %s640_s27 = scalar_lea.hbm %s1406_s3, %s810_s22  ;;  %s641_s28 = sshll.u32 %s1321_s20, 4  ;;  %s642_s28 = int_to_ptr.vmem [resolvable:$true] %s641_s28 }
  0x32   : > { %811 = vmatpush.msra.mxu2 %v336_v3  ;;  %v332_v11 = vadd.f32 %v304_v6, %v276_v5  ;;  %v272_v13 = vld [vmem:[#allocation2 + $0x90] sm:$0xff]  ;;  %425 = vmatpush.msra.mxu0 %v336_v3  ;;  %v307_v17 = vld [vmem:[#allocation5 + $0xc8] sm:$0xff]  ;;  %v330_v18 = vadd.f32 %v302_v9, %v274_v8  ;;  %v277_v20 = vld [vmem:[#allocation2 + $0xb8] sm:$0xff]  ;;  %s643_s29 = sshll.u32 %s640_s27, 4  ;;  %s644_s29 = int_to_ptr.hbm [resolvable:$true] %s643_s29 }
  0x33   : > { %v300_v15 = vld [vmem:[#allocation5 + $0x90] sm:$0xff]  ;;  %v335_v19 = vadd.f32 %v307_v17, %v279_v16  ;;  %v305_v21 = vld [vmem:[#allocation5 + $0xb8] sm:$0xff]  ;;  %505 = vmatpush.msra.mxu1 %v337_v14  ;;  %825 = vmatpush.msra.mxu3 %v337_v14  ;;  %v270_v22 = vld [vmem:[#allocation2 + $0x80] sm:$0xff]  ;;  %s1035_s30 = sshra.s32 %s644_s29, 4  ;;  %s1036_s30 = int_to_ptr.hbm [resolvable:$true] %s1035_s30 }
  0x34   : > { %812 = vmatpush.msra.mxu2 %v334_v7  ;;  %426 = vmatpush.msra.mxu0 %v334_v7  ;;  %v298_v23 = vld [vmem:[#allocation5 + $0x80] sm:$0xff]  ;;  %v333_v24 = vadd.f32 %v305_v21, %v277_v20  ;;  %v275_v25 = vld [vmem:[#allocation2 + $0xa8] sm:$0xff]  ;;  %v328_v26 = vadd.f32 %v300_v15, %v272_v13  ;;  %v268_v27 = vld [vmem:[#allocation2 + $0x70] sm:$0xff]  ;;  %s1037_s4 = scalar_lea.hbm %s1036_s30, 336  ;;  %p1042_p8 = scmp.lt.s32.totalorder %s1036_s30, %s1406_s3 }
  0x35   : > { %v303_v28 = vld [vmem:[#allocation5 + $0xa8] sm:$0xff]  ;;  %506 = vmatpush.msra.mxu1 %v335_v19  ;;  %826 = vmatpush.msra.mxu3 %v335_v19  ;;  %v296_v29 = vld [vmem:[#allocation5 + $0x70] sm:$0xff]  ;;  %v273_v31 = vld [vmem:[#allocation2 + $0x98] sm:$0xff]  ;;  %v326_v33 = vadd.f32 %v298_v23, %v270_v22  ;;  %p1038_p1 = scmp.ne.s32.totalorder %s1036_s30, %s1037_s4  ;;  %p1043_p10 = scmp.lt.s32.totalorder %s1041_s7, %s1037_s4 }
  0x36   : > { %813 = vmatpush.msra.mxu2 %v332_v11  ;;  %427 = vmatpush.msra.mxu0 %v332_v11  ;;  %v331_v30 = vadd.f32 %v303_v28, %v275_v25  ;;  %v301_v32 = vld [vmem:[#allocation5 + $0x98] sm:$0xff]  ;;  %v271_v34 = vld [vmem:[#allocation2 + $0x88] sm:$0xff]  ;;  %v266_v36 = vld [vmem:[#allocation2 + $0x60] sm:$0xff]  ;;  %v324_v39 = vadd.f32 %v296_v29, %v268_v27 }
  0x37   : > { %v299_v35 = vld [vmem:[#allocation5 + $0x88] sm:$0xff]  ;;  %507 = vmatpush.msra.mxu1 %v333_v24  ;;  %827 = vmatpush.msra.mxu3 %v333_v24  ;;  %v294_v37 = vld [vmem:[#allocation5 + $0x60] sm:$0xff]  ;;  %v329_v38 = vadd.f32 %v301_v32, %v273_v31  ;;  %v269_v40 = vld [vmem:[#allocation2 + $0x78] sm:$0xff]  ;;  %p1039_p2 = pnand %p1038_p1, %p1215_p5  ;;  %p1044_p11 = por %p1043_p10, %p1042_p8 }
  0x38   : > { %814 = vmatpush.msra.mxu2 %v330_v18  ;;  %428 = vmatpush.msra.mxu0 %v330_v18  ;;  %v297_v41 = vld [vmem:[#allocation5 + $0x78] sm:$0xff]  ;;  %v264_v42 = vld [vmem:[#allocation2 + $0x50] sm:$0xff]  ;;  %v327_v44 = vadd.f32 %v299_v35, %v271_v34  ;;  %v322_v45 = vadd.f32 %v294_v37, %v266_v36  ;;  %v267_v46 = vld [vmem:[#allocation2 + $0x68] sm:$0xff] }
  0x39   : > { %508 = vmatpush.msra.mxu1 %v331_v30  ;;  %828 = vmatpush.msra.mxu3 %v331_v30  ;;  %v292_v43 = vld [vmem:[#allocation5 + $0x50] sm:$0xff]  ;;  %v295_v47 = vld [vmem:[#allocation5 + $0x68] sm:$0xff]  ;;  %v262_v48 = vld [vmem:[#allocation2 + $0x40] sm:$0xff]  ;;  %v325_v50 = vadd.f32 %v297_v41, %v269_v40  ;;  %p1040_p4 = pneg %p1039_p2 }
  0x3a   : > { %815 = vmatpush.msra.mxu2 %v328_v26  ;;  %429 = vmatpush.msra.mxu0 %v328_v26  ;;  %v290_v49 = vld [vmem:[#allocation5 + $0x40] sm:$0xff]  ;;  %v320_v51 = vadd.f32 %v292_v43, %v264_v42  ;;  %v265_v52 = vld [vmem:[#allocation2 + $0x58] sm:$0xff]  ;;  %v260_v54 = vld [vmem:[#allocation2 + $0x30] sm:$0xff]  ;;  %v323_v56 = vadd.f32 %v295_v47, %v267_v46 }
  0x3b   : > { %509 = vmatpush.msra.mxu1 %v329_v38  ;;  %829 = vmatpush.msra.mxu3 %v329_v38  ;;  %v293_v53 = vld [vmem:[#allocation5 + $0x58] sm:$0xff]  ;;  %v288_v55 = vld [vmem:[#allocation5 + $0x30] sm:$0xff]  ;;  %v318_v57 = vadd.f32 %v290_v49, %v262_v48  ;;  %v263_v58 = vld [vmem:[#allocation2 + $0x48] sm:$0xff]  ;;  %p1045_p12 = pnand %p1044_p11, %p1040_p4 }
  0x3c   : > { %816 = vmatpush.msra.mxu2 %v326_v33  ;;  %430 = vmatpush.msra.mxu0 %v326_v33  ;;  %v291_v59 = vld [vmem:[#allocation5 + $0x48] sm:$0xff]  ;;  %v258_v60 = vld [vmem:[#allocation2 + $0x20] sm:$0xff]  ;;  %v321_v62 = vadd.f32 %v293_v53, %v265_v52  ;;  %v316_v63 = vadd.f32 %v288_v55, %v260_v54  ;;  %v261_v0 = vld [vmem:[#allocation2 + $0x38] sm:$0xff] }
  0x3d   : > { %510 = vmatpush.msra.mxu1 %v327_v44  ;;  %830 = vmatpush.msra.mxu3 %v327_v44  ;;  %v286_v61 = vld [vmem:[#allocation5 + $0x20] sm:$0xff]  ;;  %v289_v1 = vld [vmem:[#allocation5 + $0x38] sm:$0xff]  ;;  %v256_v2 = vld [vmem:[#allocation2 + $0x10] sm:$0xff]  ;;  %v319_v4 = vadd.f32 %v291_v59, %v263_v58 }
  0x3e   : > { %817 = vmatpush.msra.mxu2 %v324_v39  ;;  %431 = vmatpush.msra.mxu0 %v324_v39  ;;  %v284_v3 = vld [vmem:[#allocation5 + $0x10] sm:$0xff]  ;;  %v314_v5 = vadd.f32 %v286_v61, %v258_v60  ;;  %v259_v6 = vld [vmem:[#allocation2 + $0x28] sm:$0xff]  ;;  %v254_v8 = vld [vmem:[#allocation2] sm:$0xff]  ;;  %v317_v10 = vadd.f32 %v289_v1, %v261_v0 }
  0x3f   : > { %511 = vmatpush.msra.mxu1 %v325_v50  ;;  %831 = vmatpush.msra.mxu3 %v325_v50  ;;  %v287_v7 = vld [vmem:[#allocation5 + $0x28] sm:$0xff]  ;;  %v282_v9 = vld [vmem:[#allocation5] sm:$0xff]  ;;  %v312_v11 = vadd.f32 %v284_v3, %v256_v2  ;;  %v257_v12 = vld [vmem:[#allocation2 + $0x18] sm:$0xff] }
  0x40   : > { %818 = vmatpush.msra.mxu2 %v322_v45  ;;  %432 = vmatpush.msra.mxu0 %v322_v45  ;;  %v285_v13 = vld [vmem:[#allocation5 + $0x18] sm:$0xff]  ;;  %v315_v14 = vadd.f32 %v287_v7, %v259_v6  ;;  %v310_v15 = vadd.f32 %v282_v9, %v254_v8  ;;  %v255_v16 = vld [vmem:[#allocation2 + $0x8] sm:$0xff] }
  0x41   : > { %512 = vmatpush.msra.mxu1 %v323_v56  ;;  %832 = vmatpush.msra.mxu3 %v323_v56  ;;  %v283_v17 = vld [vmem:[#allocation5 + $0x8] sm:$0xff]  ;;  %v313_v18 = vadd.f32 %v285_v13, %v257_v12  ;;  %v1254_v19 = vld [vmem:[%s1247_s19 + $0x50] sm:$0xff]  ;;  %v349_v22 = vld [vmem:[%s1247_s19 + $0x58] sm:$0xff] }
  0x42   : > { %819 = vmatpush.msra.mxu2 %v320_v51  ;;  %433 = vmatpush.msra.mxu0 %v320_v51  ;;  %v311_v20 = vadd.f32 %v283_v17, %v255_v16  ;;  %v338_v21 = vld [vmem:[%s1247_s19] sm:$0xff]  ;;  %v339_v23 = vld [vmem:[%s1247_s19 + $0x8] sm:$0xff]  ;;  %v340_v25 = vld [vmem:[%s1247_s19 + $0x10] sm:$0xff] }
  0x43   : > { %513 = vmatpush.msra.mxu1 %v321_v62  ;;  %833 = vmatpush.msra.mxu3 %v321_v62  ;;  %v350_v24 = vld [vmem:[%s1247_s19 + $0x60] sm:$0xff]  ;;  %v351_v26 = vld [vmem:[%s1247_s19 + $0x68] sm:$0xff]  ;;  %v341_v27 = vld [vmem:[%s1247_s19 + $0x18] sm:$0xff] }
  0x44   : > { %820 = vmatpush.msra.mxu2 %v318_v57  ;;  %434 = vmatpush.msra.mxu0 %v318_v57  ;;  %v352_v28 = vld [vmem:[%s1247_s19 + $0x70] sm:$0xff]  ;;  %v342_v29 = vld [vmem:[%s1247_s19 + $0x20] sm:$0xff]  ;;  %v353_v30 = vld [vmem:[%s1247_s19 + $0x78] sm:$0xff] }
  0x45   : > { %514 = vmatpush.msra.mxu1 %v319_v4  ;;  %834 = vmatpush.msra.mxu3 %v319_v4  ;;  %v343_v31 = vld [vmem:[%s1247_s19 + $0x28] sm:$0xff]  ;;  %v354_v32 = vld [vmem:[%s1247_s19 + $0x80] sm:$0xff]  ;;  %v344_v33 = vld [vmem:[%s1247_s19 + $0x30] sm:$0xff] }
  0x46   : > { %821 = vmatpush.msra.mxu2 %v316_v63  ;;  %435 = vmatpush.msra.mxu0 %v316_v63  ;;  %v355_v34 = vld [vmem:[%s1247_s19 + $0x88] sm:$0xff]  ;;  %v345_v35 = vld [vmem:[%s1247_s19 + $0x38] sm:$0xff]  ;;  %v356_v36 = vld [vmem:[%s1247_s19 + $0x90] sm:$0xff] }
  0x47   : > { %515 = vmatpush.msra.mxu1 %v317_v10  ;;  %835 = vmatpush.msra.mxu3 %v317_v10  ;;  %v346_v37 = vld [vmem:[%s1247_s19 + $0x40] sm:$0xff]  ;;  %v357_v38 = vld [vmem:[%s1247_s19 + $0x98] sm:$0xff]  ;;  %v347_v39 = vld [vmem:[%s1247_s19 + $0x48] sm:$0xff] }
  0x48   : > { %822 = vmatpush.msra.mxu2 %v314_v5  ;;  %436 = vmatpush.msra.mxu0 %v314_v5  ;;  %v358_v40 = vld [vmem:[%s1247_s19 + $0xa0] sm:$0xff] }
  0x49   : > { %516 = vmatpush.msra.mxu1 %v315_v14  ;;  %836 = vmatpush.msra.mxu3 %v315_v14 }
  0x4a   : > { %823 = vmatpush.msra.mxu2 %v312_v11  ;;  %437 = vmatpush.msra.mxu0 %v312_v11 }
  0x4b   : > { %517 = vmatpush.msra.mxu1 %v313_v18  ;;  %837 = vmatpush.msra.mxu3 %v313_v18 }
  0x4c   : > { %824 = vmatpush.msra.mxu2 %v310_v15  ;;  %438 = vmatpush.msra.mxu0 %v310_v15 }
  0x4d   : > { %771 = vmatmul.msk.f32.vlgmr.msra.gmra.mxu2 %vm359_vm0, %v1254_v19  ;;  %761 = vmatmul.msk.f32.vlgmr.msra.gmra.mxu0 %vm359_vm0, %v338_v21 }
  0x4e   : > { %518 = vmatpush.msra.mxu1 %v311_v20  ;;  %838 = vmatpush.msra.mxu3 %v311_v20 }
  0x4f   : > { %782 = vmatmul.msk.f32.vlgmr.msra.gmra.mxu1 %vm359_vm0, %v338_v21  ;;  %793 = vmatmul.msk.f32.vlgmr.msra.gmra.mxu3 %vm359_vm0, %v349_v22 }
  0x55   : > { %772 = vmatmul.msk.f32.gmra.mxu2 %vm359_vm0, %v349_v22  ;;  %762 = vmatmul.msk.f32.gmra.mxu0 %vm359_vm0, %v339_v23 }
  0x57   : > { %783 = vmatmul.msk.f32.gmra.mxu1 %vm359_vm0, %v339_v23  ;;  %794 = vmatmul.msk.f32.gmra.mxu3 %vm359_vm0, %v350_v24 }
  0x5d   : > { %773 = vmatmul.msk.f32.gmra.mxu2 %vm359_vm0, %v350_v24  ;;  %763 = vmatmul.msk.f32.gmra.mxu0 %vm359_vm0, %v340_v25 }
  0x5f   : > { %784 = vmatmul.msk.f32.gmra.mxu1 %vm359_vm0, %v340_v25  ;;  %795 = vmatmul.msk.f32.gmra.mxu3 %vm359_vm0, %v351_v26 }
  0x65   : > { %774 = vmatmul.msk.f32.gmra.mxu2 %vm359_vm0, %v351_v26  ;;  %764 = vmatmul.msk.f32.gmra.mxu0 %vm359_vm0, %v341_v27 }
  0x67   : > { %785 = vmatmul.msk.f32.gmra.mxu1 %vm359_vm0, %v341_v27  ;;  %796 = vmatmul.msk.f32.gmra.mxu3 %vm359_vm0, %v352_v28 }
  0x6d   : > { %775 = vmatmul.msk.f32.gmra.mxu2 %vm359_vm0, %v352_v28  ;;  %765 = vmatmul.msk.f32.gmra.mxu0 %vm359_vm0, %v342_v29 }
  0x6f   : > { %786 = vmatmul.msk.f32.gmra.mxu1 %vm359_vm0, %v342_v29  ;;  %797 = vmatmul.msk.f32.gmra.mxu3 %vm359_vm0, %v353_v30 }
  0x75   : > { %776 = vmatmul.msk.f32.gmra.mxu2 %vm359_vm0, %v353_v30  ;;  %766 = vmatmul.msk.f32.gmra.mxu0 %vm359_vm0, %v343_v31 }
  0x77   : > { %787 = vmatmul.msk.f32.gmra.mxu1 %vm359_vm0, %v343_v31  ;;  %798 = vmatmul.msk.f32.gmra.mxu3 %vm359_vm0, %v354_v32 }
  0x7d   : > { %777 = vmatmul.msk.f32.gmra.mxu2 %vm359_vm0, %v354_v32  ;;  %767 = vmatmul.msk.f32.gmra.mxu0 %vm359_vm0, %v344_v33 }
  0x7f   : > { %788 = vmatmul.msk.f32.gmra.mxu1 %vm359_vm0, %v344_v33  ;;  %799 = vmatmul.msk.f32.gmra.mxu3 %vm359_vm0, %v355_v34 }
  0x85   : > { %778 = vmatmul.msk.f32.gmra.mxu2 %vm359_vm0, %v355_v34  ;;  %768 = vmatmul.msk.f32.gmra.mxu0 %vm359_vm0, %v345_v35 }
  0x87   : > { %789 = vmatmul.msk.f32.gmra.mxu1 %vm359_vm0, %v345_v35  ;;  %800 = vmatmul.msk.f32.gmra.mxu3 %vm359_vm0, %v356_v36 }
  0x8d   : > { %779 = vmatmul.msk.f32.gmra.mxu2 %vm359_vm0, %v356_v36  ;;  %769 = vmatmul.msk.f32.gmra.mxu0 %vm359_vm0, %v346_v37 }
  0x8f   : > { %790 = vmatmul.msk.f32.gmra.mxu1 %vm359_vm0, %v346_v37  ;;  %801 = vmatmul.msk.f32.gmra.mxu3 %vm359_vm0, %v357_v38 }
  0x95   : > { %780 = vmatmul.msk.f32.gmra.mxu2 %vm359_vm0, %v357_v38  ;;  %770 = vmatmul.msk.f32.gmra.mxu0 %vm359_vm0, %v347_v39 }
  0x97   : > { %791 = vmatmul.msk.f32.gmra.mxu1 %vm359_vm0, %v347_v39  ;;  %802 = vmatmul.msk.f32.gmra.mxu3 %vm359_vm0, %v358_v40 }
  0x9d   : > { %781 = vmatmul.msk.f32.gmra.mxu2 %vm359_vm0, %v358_v40 }
  0x9f   : > { %792 = vmatmul.msk.f32.gmra.mxu1 %vm359_vm0, %v1254_v19 }
  0xca   : > { %v440_v41 = vpop.f32.mrf.mxu0 }
  0xcb   : > { %583 = vst [vmem:[%s1321_s20] sm:$0xff] %v440_v41 }
  0xcc   : > { %v520_v42 = vpop.f32.mrf.mxu1 }
  0xcd   : > { %584 = vst [vmem:[%s1321_s20 + $0x8] sm:$0xff] %v520_v42 }
  0xd0   : > { %v470_v43 = vpop.f32.mrf.mxu2 }
  0xd1   : > { %603 = vst [vmem:[%s1321_s20 + $0xa0] sm:$0xff] %v470_v43 }
  0xd2   : > { %v443_v44 = vpop.f32.mrf.mxu0  ;;  %v553_v45 = vpop.f32.mrf.mxu3 }
  0xd3   : > { %585 = vst [vmem:[%s1321_s20 + $0x10] sm:$0xff] %v443_v44 }
  0xd4   : > { %v523_v46 = vpop.f32.mrf.mxu1  ;;  %606 = vst [vmem:[%s1321_s20 + $0xb8] sm:$0xff] %v553_v45 }
  0xd5   : > { %586 = vst [vmem:[%s1321_s20 + $0x18] sm:$0xff] %v523_v46 }
  0xd8   : > { %v473_v47 = vpop.f32.mrf.mxu2 }
  0xd9   : > { %605 = vst [vmem:[%s1321_s20 + $0xb0] sm:$0xff] %v473_v47 }
  0xda   : > { %v446_v48 = vpop.f32.mrf.mxu0  ;;  %v556_v49 = vpop.f32.mrf.mxu3 }
  0xdb   : > { %587 = vst [vmem:[%s1321_s20 + $0x20] sm:$0xff] %v446_v48 }
  0xdc   : > { %v526_v50 = vpop.f32.mrf.mxu1  ;;  %608 = vst [vmem:[%s1321_s20 + $0xc8] sm:$0xff] %v556_v49 }
  0xdd   : > { %588 = vst [vmem:[%s1321_s20 + $0x28] sm:$0xff] %v526_v50 }
  0xe0   : > { %v476_v51 = vpop.f32.mrf.mxu2 }
  0xe1   : > { %607 = vst [vmem:[%s1321_s20 + $0xc0] sm:$0xff] %v476_v51 }
  0xe2   : > { %v449_v52 = vpop.f32.mrf.mxu0  ;;  %v559_v53 = vpop.f32.mrf.mxu3 }
  0xe3   : > { %589 = vst [vmem:[%s1321_s20 + $0x30] sm:$0xff] %v449_v52 }
  0xe4   : > { %v529_v54 = vpop.f32.mrf.mxu1  ;;  %610 = vst [vmem:[%s1321_s20 + $0xd8] sm:$0xff] %v559_v53 }
  0xe5   : > { %590 = vst [vmem:[%s1321_s20 + $0x38] sm:$0xff] %v529_v54 }
  0xe8   : > { %v479_v55 = vpop.f32.mrf.mxu2 }
  0xe9   : > { %609 = vst [vmem:[%s1321_s20 + $0xd0] sm:$0xff] %v479_v55 }
  0xea   : > { %v452_v56 = vpop.f32.mrf.mxu0  ;;  %v562_v57 = vpop.f32.mrf.mxu3 }
  0xeb   : > { %591 = vst [vmem:[%s1321_s20 + $0x40] sm:$0xff] %v452_v56 }
  0xec   : > { %v532_v58 = vpop.f32.mrf.mxu1  ;;  %612 = vst [vmem:[%s1321_s20 + $0xe8] sm:$0xff] %v562_v57 }
  0xed   : > { %592 = vst [vmem:[%s1321_s20 + $0x48] sm:$0xff] %v532_v58 }
  0xf0   : > { %v482_v59 = vpop.f32.mrf.mxu2 }
  0xf1   : > { %611 = vst [vmem:[%s1321_s20 + $0xe0] sm:$0xff] %v482_v59 }
  0xf2   : > { %v455_v60 = vpop.f32.mrf.mxu0  ;;  %v565_v61 = vpop.f32.mrf.mxu3 }
  0xf3   : > { %593 = vst [vmem:[%s1321_s20 + $0x50] sm:$0xff] %v455_v60 }
  0xf4   : > { %v535_v62 = vpop.f32.mrf.mxu1  ;;  %614 = vst [vmem:[%s1321_s20 + $0xf8] sm:$0xff] %v565_v61 }
  0xf5   : > { %594 = vst [vmem:[%s1321_s20 + $0x58] sm:$0xff] %v535_v62 }
  0xf8   : > { %v485_v63 = vpop.f32.mrf.mxu2 }
  0xf9   : > { %613 = vst [vmem:[%s1321_s20 + $0xf0] sm:$0xff] %v485_v63 }
  0xfa   : > { %v458_v0 = vpop.f32.mrf.mxu0  ;;  %v568_v1 = vpop.f32.mrf.mxu3 }
  0xfb   : > { %595 = vst [vmem:[%s1321_s20 + $0x60] sm:$0xff] %v458_v0 }
  0xfc   : > { %v538_v2 = vpop.f32.mrf.mxu1  ;;  %616 = vst [vmem:[%s1321_s20 + $0x108] sm:$0xff] %v568_v1 }
  0xfd   : > { %596 = vst [vmem:[%s1321_s20 + $0x68] sm:$0xff] %v538_v2 }
 0x100   : > { %v488_v3 = vpop.f32.mrf.mxu2 }
 0x101   : > { %615 = vst [vmem:[%s1321_s20 + $0x100] sm:$0xff] %v488_v3 }
 0x102   : > { %v461_v4 = vpop.f32.mrf.mxu0  ;;  %v571_v5 = vpop.f32.mrf.mxu3 }
 0x103   : > { %597 = vst [vmem:[%s1321_s20 + $0x70] sm:$0xff] %v461_v4 }
 0x104   : > { %v541_v6 = vpop.f32.mrf.mxu1  ;;  %618 = vst [vmem:[%s1321_s20 + $0x118] sm:$0xff] %v571_v5 }
 0x105   : > { %598 = vst [vmem:[%s1321_s20 + $0x78] sm:$0xff] %v541_v6 }
 0x108   : > { %v491_v7 = vpop.f32.mrf.mxu2 }
 0x109   : > { %617 = vst [vmem:[%s1321_s20 + $0x110] sm:$0xff] %v491_v7 }
 0x10a   : > { %v464_v8 = vpop.f32.mrf.mxu0  ;;  %v574_v9 = vpop.f32.mrf.mxu3 }
 0x10b   : > { %599 = vst [vmem:[%s1321_s20 + $0x80] sm:$0xff] %v464_v8 }
 0x10c   : > { %v544_v10 = vpop.f32.mrf.mxu1  ;;  %620 = vst [vmem:[%s1321_s20 + $0x128] sm:$0xff] %v574_v9 }
 0x10d   : > { %600 = vst [vmem:[%s1321_s20 + $0x88] sm:$0xff] %v544_v10 }
 0x110   : > { %v494_v11 = vpop.f32.mrf.mxu2 }
 0x111   : > { %619 = vst [vmem:[%s1321_s20 + $0x120] sm:$0xff] %v494_v11 }
 0x112   : > { %v467_v12 = vpop.f32.mrf.mxu0  ;;  %v577_v13 = vpop.f32.mrf.mxu3 }
 0x113   : > { %601 = vst [vmem:[%s1321_s20 + $0x90] sm:$0xff] %v467_v12 }
 0x114   : > { %v547_v14 = vpop.f32.mrf.mxu1  ;;  %622 = vst [vmem:[%s1321_s20 + $0x138] sm:$0xff] %v577_v13 }
 0x115   : > { %602 = vst [vmem:[%s1321_s20 + $0x98] sm:$0xff] %v547_v14 }
 0x118   : > { %v497_v15 = vpop.f32.mrf.mxu2 }
 0x119   : > { %621 = vst [vmem:[%s1321_s20 + $0x130] sm:$0xff] %v497_v15 }
 0x11a   : > { %v580_v16 = vpop.f32.mrf.mxu3 }
 0x11b   : > { %624 = vst [vmem:[%s1321_s20 + $0x148] sm:$0xff] %v580_v16 }
 0x11c   : > { %v550_v17 = vpop.f32.mrf.mxu1 }
 0x11d   : > { %604 = vst [vmem:[%s1321_s20 + $0xa8] sm:$0xff] %v550_v17 }
 0x120   : > { %v500_v18 = vpop.f32.mrf.mxu2 }
 0x121   : > { %623 = vst [vmem:[%s1321_s20 + $0x140] sm:$0xff] %v500_v18 }
 0x122   : > { %1048 = shalt.err (!%p1045_p12)
}
 0x123   : > { %s1119_s0 = smov 256   ;;  %s1120_s11 = smov 16  }
 0x124   : > { %852 = dma.vmem_to_hbm [thread:$0]  (%p1215_p5), %s642_s28, 5376, %s644_s29, %s626_s15, %s1119_s0, %s1119_s0, %s1120_s11  }
 0x125 PF: > { %p874_p13 = scmp.ge.s32.totalorder %s1111_s17, 2  ;;  %s658_s19 = sand.u32 1, %s1091_s12  }
 0x126   : > { %s659_s18 = scalar_lea.sflag [#allocation4], %s658_s19 }
 0x127   : > { %p866_p0 = pnand %p874_p13, %p1186_p6 }
 0x129   : > { %p867_p3 = pneg %p866_p0 }
 0x12b   : > { %1086 = dma.done.wait (%p867_p3), %s659_s18, 5376  }
 0x12c   : > { %1088 = vsyncadd (%p867_p3), %s659_s18, 4294961920  ;;  %s18_s17 = sadd.s32 1, %s1111_s17   ;;  %s1413_s12 = smov %s1095_s13 }
 0x12d   : > { %p15_p7 = scmp.ge.s32.totalorder %s18_s17, 6   ;;  %s1414_s13 = smov %s1099_s14 }
 0x12e   : > { %s1415_s14 = smov %s1225_s24  ;;  %s1416_s15 = smov %s1107_s16 }
 0x12f   : > { %s1417_s16 = smov %s1419_s8  ;;  %17 = sbr.rel (!%p15_p7) target bundleno = 8 (0x8), region = 86 }
 0x134   :  { %665 = vsyncpa [#allocation3], 1 }
 0x135   :  { %667 = vsyncpa [#allocation3 + $0x1], 1 }
 0x136   :  { %668 = vsyncpa [#allocation6], 1 }
 0x137   :  { %669 = vsyncpa [#allocation4], 1 }
 0x138   :  { %671 = vsyncpa [#allocation4 + $0x1], 1 }

</bundles_post_ra>
